<compile_context>
chip_gen: v7x
topology: tpu7x:2x2x1
jax: 0.10.0
libtpu: 0.0.40
codegen_flags: <defaults>
</compile_context>

<pallas_src>
import functools

import jax
import jax.numpy as jnp
from jax.experimental import pallas as pl
from jax.experimental.pallas import tpu as pltpu

HIDDEN = 16  # matches hidden_features in the PyTorch module
_MiB = 1024 * 1024


def _round_up(n, m):
    return ((n + m - 1) // m) * m


def _mlp_kernel(x_ref, w1_ref, b1_ref, w2_ref, b2_ref, w3_ref, b3_ref, o_ref):
    # Fully fused hot path, all f32: 3 MXU matmuls + VPU bias-add / ReLU.
    x = x_ref[...]                                                   # (TB, k_in)

    h = jnp.dot(x, w1_ref[...], preferred_element_type=jnp.float32) + b1_ref[...]
    h = jnp.maximum(h, 0.0)

    h = jnp.dot(h, w2_ref[...], preferred_element_type=jnp.float32) + b2_ref[...]
    h = jnp.maximum(h, 0.0)

    y = jnp.dot(h, w3_ref[...], preferred_element_type=jnp.float32) + b3_ref[...]
    o_ref[...] = y.astype(o_ref.dtype)                               # (TB, k_out)


def _vmem_capacity_bytes():
    """Best-effort query of per-core VMEM; conservative (v7x) fallback."""
    try:
        info = pltpu.get_tpu_info()
        cap = getattr(info, "vmem_capacity_bytes", None)
        if cap:
            return int(cap)
    except Exception:
        pass
    return 64 * _MiB  # conservative: v7x per-TC VMEM


def _auto_tile(vmem_bytes):
    # Per batch row the double-buffered, lane-padded (->128 lanes) f32 in/out
    # blocks cost ~2 KiB of VMEM; keep the pipeline buffers well under half
    # of the chip's VMEM.
    if vmem_bytes >= 100 * _MiB:   # v5e / v6e (128 MiB VMEM)
        return 16384               # ~32 MiB of pipeline buffers
    return 8192                    # v7x (64 MiB VMEM) -> ~16 MiB of buffers


@functools.partial(jax.jit, static_argnames=("tb_eff", "vmem_limit"))
def _spec_op_impl(x, w1, b1, w2, b2, w3, b3, *, tb_eff, vmem_limit):
    B, k_in = x.shape
    hidden = w1.shape[1]
    k_out = w3.shape[1]

    grid = (pl.cdiv(B, tb_eff),)   # partial trailing tile handled by masking

    # Weights / biases: same block every grid step -> stay VMEM-resident.
    resident = lambda shape: pl.BlockSpec(shape, lambda i: (0, 0))

    flops = 2 * B * (k_in * hidden + hidden * hidden + hidden * k_out)
    bytes_accessed = (
        x.size * x.dtype.itemsize            # streamed f32 input
        + B * k_out * 4                      # streamed f32 output
        + sum(a.size * a.dtype.itemsize
              for a in (w1, b1, w2, b2, w3, b3)))

    return pl.pallas_call(
        _mlp_kernel,
        out_shape=jax.ShapeDtypeStruct((B, k_out), jnp.float32),
        grid=grid,
        in_specs=[
            pl.BlockSpec((tb_eff, k_in), lambda i: (i, 0)),   # streamed x tile
            resident((k_in, hidden)),
            resident((1, hidden)),
            resident((hidden, hidden)),
            resident((1, hidden)),
            resident((hidden, k_out)),
            resident((1, k_out)),
        ],
        out_specs=pl.BlockSpec((tb_eff, k_out), lambda i: (i, 0)),
        compiler_params=pltpu.CompilerParams(
            dimension_semantics=("parallel",),
            vmem_limit_bytes=vmem_limit,
        ),
        cost_estimate=pl.CostEstimate(
            flops=flops, transcendentals=0, bytes_accessed=bytes_accessed),
    )(x, w1, b1, w2, b2, w3, b3)


def spec_op(x, w1, b1, w2, b2, w3, b3, *, tb=None):
    """Fused forward pass. x: [B, k_in] -> [B, k_out] (float32)."""
    B = x.shape[0]
    vmem_bytes = _vmem_capacity_bytes()
    if tb is None:
        tb = _auto_tile(vmem_bytes)
    assert tb % 8 == 0, "batch tile must be a multiple of 8 (f32 sublanes)"

    # Effective tile: never larger than the array along the blocked dim
    # (a partial *last* block is fine; a block larger than the array is not
    # needed).  For B < 8 the block equals the full array dim, which is also
    # allowed by the (8,128) rule.
    if B >= 8:
        tb_eff = min(tb, (B // 8) * 8)
    else:
        tb_eff = max(B, 1)

    # Double-buffered, lane-padded (->128 lanes) f32 x/out blocks + margin,
    # clamped below physical VMEM.
    buf_bytes = 2 * tb_eff * 128 * 4 * 2
    vmem_limit = int(max(32 * _MiB,
                         min(buf_bytes + 8 * _MiB, vmem_bytes - 8 * _MiB)))

    x = x.astype(jnp.float32)
    w1, b1, w2, b2, w3, b3 = (a.astype(jnp.float32)
                              for a in (w1, b1, w2, b2, w3, b3))
    return _spec_op_impl(x, w1, b1, w2, b2, w3, b3,
                         tb_eff=tb_eff, vmem_limit=vmem_limit)


def init_params(key, k_in, k_out):
    """Deterministic init mimicking nn.Linear's U(-1/sqrt(fan_in), 1/sqrt(fan_in)).

    Weights stored [in, out] so the kernel computes x @ W + b (equivalent to
    PyTorch's x @ W.T with its [out, in] storage). Biases kept as [1, out] rows.
    """
    ks = jax.random.split(key, 6)

    def linear(kw, kb, fan_in, fan_out):
        bound = 1.0 / jnp.sqrt(fan_in)
        w = jax.random.uniform(kw, (fan_in, fan_out), jnp.float32, -bound, bound)
        b = jax.random.uniform(kb, (1, fan_out), jnp.float32, -bound, bound)
        return w, b

    w1, b1 = linear(ks[0], ks[1], k_in, HIDDEN)
    w2, b2 = linear(ks[2], ks[3], HIDDEN, HIDDEN)
    w3, b3 = linear(ks[4], ks[5], HIDDEN, k_out)
    return w1, b1, w2, b2, w3, b3


def spec_op_ref(x, w1, b1, w2, b2, w3, b3):
    """Pure-JAX f32 reference (same math as the PyTorch module)."""
    h = jnp.maximum(x @ w1 + b1, 0.0)
    h = jnp.maximum(h @ w2 + b2, 0.0)
    return h @ w3 + b3


if __name__ == "__main__":
    key = jax.random.PRNGKey(0)
    k_x, k_x2, k_p = jax.random.split(key, 3)

    k_in, k_out = 32, 8
    params = init_params(k_p, k_in, k_out)

    # Case 1: multi-step batch grid (B=256, tb=64 -> 4 pipelined grid steps).
    B = 256
    x = jax.random.normal(k_x, (B, k_in), jnp.float32)
    out = jax.block_until_ready(spec_op(x, *params, tb=64))
    assert out.shape == (B, k_out), out.shape
    ref = spec_op_ref(x, *params)
    assert jnp.allclose(out, ref, atol=2e-2, rtol=2e-2), "mismatch vs f32 ref"

    # Case 2: tiny, non-multiple batch exercises the partial trailing tile
    # (no jnp.pad copy) and the generation-aware auto tile selection.
    B2 = 10
    x2 = jax.random.normal(k_x2, (B2, k_in), jnp.float32)
    out2 = jax.block_until_ready(spec_op(x2, *params))
    assert out2.shape == (B2, k_out), out2.shape
    assert jnp.allclose(out2, spec_op_ref(x2, *params), atol=2e-2, rtol=2e-2), \
        "mismatch vs f32 ref (small batch)"

    print("KERNEL_OK")
</pallas_src>

<mosaic_0001>
module attributes {stable_mosaic.version = 11 : i64} {
  func.func @_mlp_kernel(%arg0: i32, %arg1: memref<64x32xf32, #tpu.memory_space<vmem>>, %arg2: memref<32x16xf32, #tpu.memory_space<vmem>>, %arg3: memref<1x16xf32, #tpu.memory_space<vmem>>, %arg4: memref<16x16xf32, #tpu.memory_space<vmem>>, %arg5: memref<1x16xf32, #tpu.memory_space<vmem>>, %arg6: memref<16x8xf32, #tpu.memory_space<vmem>>, %arg7: memref<1x8xf32, #tpu.memory_space<vmem>>, %arg8: memref<64x8xf32, #tpu.memory_space<vmem>>) attributes {dimension_semantics = [#tpu.dimension_semantics<parallel>], iteration_bounds = array<i64: 4>, scalar_prefetch = 0 : i64, scratch_operands = 0 : i64, tpu.core_type = #tpu.core_type<tc>, window_params = [{transform_indices = @transform_0, window_bounds = array<i64: 64, 32>}, {pipeline_mode = #tpu.pipeline_mode<synchronous>, transform_indices = @transform_1, window_bounds = array<i64: 32, 16>}, {pipeline_mode = #tpu.pipeline_mode<synchronous>, transform_indices = @transform_2, window_bounds = array<i64: 1, 16>}, {pipeline_mode = #tpu.pipeline_mode<synchronous>, transform_indices = @transform_3, window_bounds = array<i64: 16, 16>}, {pipeline_mode = #tpu.pipeline_mode<synchronous>, transform_indices = @transform_4, window_bounds = array<i64: 1, 16>}, {pipeline_mode = #tpu.pipeline_mode<synchronous>, transform_indices = @transform_5, window_bounds = array<i64: 16, 8>}, {pipeline_mode = #tpu.pipeline_mode<synchronous>, transform_indices = @transform_6, window_bounds = array<i64: 1, 8>}, {transform_indices = @transform_7, window_bounds = array<i64: 64, 8>}]} {
    %c0 = arith.constant 0 : index
    %c0_0 = arith.constant 0 : index
    %0 = vector.load %arg1[%c0, %c0_0] : memref<64x32xf32, #tpu.memory_space<vmem>>, vector<64x32xf32>
    %c0_1 = arith.constant 0 : index
    %c0_2 = arith.constant 0 : index
    %1 = vector.load %arg2[%c0_1, %c0_2] : memref<32x16xf32, #tpu.memory_space<vmem>>, vector<32x16xf32>
    %cst = arith.constant dense<0.000000e+00> : vector<64x16xf32>
    %2 = tpu.matmul %0, %1, %cst {dimension_numbers = #tpu.dot_dimension_numbers<[1], [0], [0], [1], [0, 0, 1, 1], [], []>} : vector<64x32xf32>, vector<32x16xf32>, vector<64x16xf32> -> vector<64x16xf32>
    %c0_3 = arith.constant 0 : index
    %c0_4 = arith.constant 0 : index
    %3 = vector.load %arg3[%c0_3, %c0_4] : memref<1x16xf32, #tpu.memory_space<vmem>>, vector<1x16xf32>
    %4 = vector.broadcast %3 : vector<1x16xf32> to vector<64x16xf32>
    %5 = arith.addf %2, %4 : vector<64x16xf32>
    %cst_5 = arith.constant 0.000000e+00 : f32
    %6 = vector.broadcast %cst_5 : f32 to vector<64x16xf32>
    %7 = arith.maximumf %5, %6 : vector<64x16xf32>
    %c0_6 = arith.constant 0 : index
    %c0_7 = arith.constant 0 : index
    %8 = vector.load %arg4[%c0_6, %c0_7] : memref<16x16xf32, #tpu.memory_space<vmem>>, vector<16x16xf32>
    %cst_8 = arith.constant dense<0.000000e+00> : vector<64x16xf32>
    %9 = tpu.matmul %7, %8, %cst_8 {dimension_numbers = #tpu.dot_dimension_numbers<[1], [0], [0], [1], [0, 0, 1, 1], [], []>} : vector<64x16xf32>, vector<16x16xf32>, vector<64x16xf32> -> vector<64x16xf32>
    %c0_9 = arith.constant 0 : index
    %c0_10 = arith.constant 0 : index
    %10 = vector.load %arg5[%c0_9, %c0_10] : memref<1x16xf32, #tpu.memory_space<vmem>>, vector<1x16xf32>
    %11 = vector.broadcast %10 : vector<1x16xf32> to vector<64x16xf32>
    %12 = arith.addf %9, %11 : vector<64x16xf32>
    %cst_11 = arith.constant 0.000000e+00 : f32
    %13 = vector.broadcast %cst_11 : f32 to vector<64x16xf32>
    %14 = arith.maximumf %12, %13 : vector<64x16xf32>
    %c0_12 = arith.constant 0 : index
    %c0_13 = arith.constant 0 : index
    %15 = vector.load %arg6[%c0_12, %c0_13] : memref<16x8xf32, #tpu.memory_space<vmem>>, vector<16x8xf32>
    %cst_14 = arith.constant dense<0.000000e+00> : vector<64x8xf32>
    %16 = tpu.matmul %14, %15, %cst_14 {dimension_numbers = #tpu.dot_dimension_numbers<[1], [0], [0], [1], [0, 0, 1, 1], [], []>} : vector<64x16xf32>, vector<16x8xf32>, vector<64x8xf32> -> vector<64x8xf32>
    %c0_15 = arith.constant 0 : index
    %c0_16 = arith.constant 0 : index
    %17 = vector.load %arg7[%c0_15, %c0_16] : memref<1x8xf32, #tpu.memory_space<vmem>>, vector<1x8xf32>
    %18 = vector.broadcast %17 : vector<1x8xf32> to vector<64x8xf32>
    %19 = arith.addf %16, %18 : vector<64x8xf32>
    %c0_17 = arith.constant 0 : index
    %c0_18 = arith.constant 0 : index
    %20 = vector.load %arg8[%c0_17, %c0_18] : memref<64x8xf32, #tpu.memory_space<vmem>>, vector<64x8xf32>
    tpu.vector_store %arg8[%c0_17, %c0_18], %19 {strides = array<i32>} : memref<64x8xf32, #tpu.memory_space<vmem>>, vector<64x8xf32>,
    return
  }
  func.func @transform_0(%arg0: i32) -> (i32, i32) {
    %c0_i32 = arith.constant 0 : i32
    %c0_i32_0 = arith.constant 0 : i32
    return %arg0, %c0_i32 : i32, i32
  }
  func.func @transform_1(%arg0: i32) -> (i32, i32) {
    %c0_i32 = arith.constant 0 : i32
    %c0_i32_0 = arith.constant 0 : i32
    %c0_i32_1 = arith.constant 0 : i32
    return %c0_i32, %c0_i32_0 : i32, i32
  }
  func.func @transform_2(%arg0: i32) -> (i32, i32) {
    %c0_i32 = arith.constant 0 : i32
    %c0_i32_0 = arith.constant 0 : i32
    %c0_i32_1 = arith.constant 0 : i32
    return %c0_i32, %c0_i32_0 : i32, i32
  }
  func.func @transform_3(%arg0: i32) -> (i32, i32) {
    %c0_i32 = arith.constant 0 : i32
    %c0_i32_0 = arith.constant 0 : i32
    %c0_i32_1 = arith.constant 0 : i32
    return %c0_i32, %c0_i32_0 : i32, i32
  }
  func.func @transform_4(%arg0: i32) -> (i32, i32) {
    %c0_i32 = arith.constant 0 : i32
    %c0_i32_0 = arith.constant 0 : i32
    %c0_i32_1 = arith.constant 0 : i32
    return %c0_i32, %c0_i32_0 : i32, i32
  }
  func.func @transform_5(%arg0: i32) -> (i32, i32) {
    %c0_i32 = arith.constant 0 : i32
    %c0_i32_0 = arith.constant 0 : i32
    %c0_i32_1 = arith.constant 0 : i32
    return %c0_i32, %c0_i32_0 : i32, i32
  }
  func.func @transform_6(%arg0: i32) -> (i32, i32) {
    %c0_i32 = arith.constant 0 : i32
    %c0_i32_0 = arith.constant 0 : i32
    %c0_i32_1 = arith.constant 0 : i32
    return %c0_i32, %c0_i32_0 : i32, i32
  }
  func.func @transform_7(%arg0: i32) -> (i32, i32) {
    %c0_i32 = arith.constant 0 : i32
    %c0_i32_0 = arith.constant 0 : i32
    return %arg0, %c0_i32 : i32, i32
  }
}

</mosaic_0001>

<bundles_post_ra>
// kernel: _spec_op_impl.1
= control target key start
LH: loop header
LB: loop body
LE: loop exit
PB: predicated region body
PF: predicated region fallthrough
CT: control target
= control target key end

     0   :  { %s985_s24 = smov 0   ;;  %s1074_s0 = inlined_call_operand.vmem [shape: f32[256,32], index: 0, kind: input, shape index: {}]   ;;  %s1075_s1 = inlined_call_operand.vmem [shape: f32[32,16], index: 1, kind: input, shape index: {}]   ;;  %s1076_s2 = inlined_call_operand.vmem [shape: f32[1,16], index: 2, kind: input, shape index: {}]   ;;  %s1077_s3 = inlined_call_operand.vmem [shape: f32[16,16], index: 3, kind: input, shape index: {}]   ;;  %s1078_s4 = inlined_call_operand.vmem [shape: f32[1,16], index: 4, kind: input, shape index: {}]   ;;  %s1079_s5 = inlined_call_operand.vmem [shape: f32[16,8], index: 5, kind: input, shape index: {}]   ;;  %s1080_s6 = inlined_call_operand.vmem [shape: f32[1,8], index: 6, kind: input, shape index: {}]   ;;  %s1081_s7 = inlined_call_operand.vmem [shape: f32[256,8], index: 7, kind: output, shape index: {}]  }
   0x1 LB: > { %s789_s25 = sadd.s32 4294967295, %s943_s24   ;;  %p793_p0 = scmp.ge.s32.totalorder %s943_s24, 1  ;;  %s943_s24 = sphi %s985_s24, %s17_s24  }
   0x2   : > { %p238_p1 = scmp.lt.s32.totalorder %s943_s24, 5 }
   0x4   : > { %p239_p2 = pnand %p793_p0, %p238_p1 }
   0x5   : > { %v290_v0 = vld [vmem:[%s1075_s1] sm:$0xff] (!%p239_p2)  ;;  %v291_v1 = vld [vmem:[%s1075_s1 + $0x8] sm:$0xff] (!%p239_p2)  ;;  %v292_v2 = vld [vmem:[%s1075_s1 + $0x10] sm:$0xff] (!%p239_p2)  ;;  %s794_s9 = sshll.u32 (!%p239_p2), %s789_s25, 3  ;;  %vm301_vm0 = vcmask (!%p239_p2), 261120   ;;  %vm448_vm1 = vcmask (!%p239_p2), 130048  }
   0x6   : > { %242 = sbr.rel (%p239_p2) target bundleno = 682 (0x2aa), region = 48  ;;  %v911_v3 = vpack.c.bf16 (!%p239_p2), %v291_v1, %v290_v0  ;;  %v293_v4 = vld [vmem:[%s1075_s1 + $0x18] sm:$0xff] (!%p239_p2)  ;;  %p271_p3 = scmp.lt.s32.totalorder (!%p239_p2), %s794_s9, 31  ;;  %v439_v5 = vld [vmem:[%s1077_s3] sm:$0xff] (!%p239_p2)  ;;  %v440_v6 = vld [vmem:[%s1077_s3 + $0x8] sm:$0xff] (!%p239_p2)  ;;  %vm724_vm2 = vcmask (!%p239_p2), 64512  }
   0x7   : > { %v915_v7 = vpack.c.bf16 (!%p239_p2), %v293_v4, %v292_v2  ;;  %v919_v8 = vpack.c.bf16 (!%p239_p2), %v440_v6, %v439_v5  ;;  %v586_v17 = vld [vmem:[%s1079_s5] sm:$0xff] (!%p239_p2)  ;;  %v587_v18 = vld [vmem:[%s1079_s5 + $0x8] sm:$0xff] (!%p239_p2) }
   0x8   : > { %912 = vmatprep.subr.bf16.mxu0 (!%p239_p2), %v911_v3  ;;  %v923_v19 = vpack.c.bf16 (!%p239_p2), %v587_v18, %v586_v17  ;;  %v798_v20 = vld [vmem:[%s1076_s2] ss:$0 sm:$0xff] (!%p239_p2) }
   0x9   : > { %914 = vmatpush3.bf16.msra.mxu0 (!%p239_p2), %v911_v3  ;;  %927 = vmatprep.subr.bf16.mxu1 (!%p239_p2), %v919_v8  ;;  %v807_v45 = vld [vmem:[%s1078_s4] ss:$0 sm:$0xff] (!%p239_p2) }
   0xa   : > { %916 = vmatprep.subr.bf16.mxu0 (!%p239_p2), %v915_v7  ;;  %928 = vmatpush3.bf16.msra.mxu1 (!%p239_p2), %v919_v8  ;;  %v816_v6 = vld [vmem:[%s1080_s6] ss:$0 sm:$0xff] (!%p239_p2) }
   0xb   : > { %924 = vmatprep.subr.bf16.mxu1 (!%p239_p2), %v923_v19 }
   0xd   : > { %s1083_s9 = smov (!%p271_p3, %s794_s9), 31  ;;  %918 = vmatpush3.bf16.msra.mxu0 %v915_v7 }
   0xe   : > { %s795_s16 = sshll.u32 %s1083_s9, 3  ;;  %920 = vmatprep.subr.bf16.mxu0 %v919_v8 }
   0xf   : > { %s274_s19 = scalar_lea.vmem %s1074_s0, %s795_s16  ;;  %s280_s11 = scalar_lea.vmem %s1081_s7, %s795_s16 }
  0x10   : > { %v282_v9 = vld [vmem:[%s274_s19] sm:$0xff]  ;;  %v283_v10 = vld [vmem:[%s274_s19 + $0x8] sm:$0xff]  ;;  %v284_v11 = vld [vmem:[%s274_s19 + $0x10] sm:$0xff] }
  0x11   : > { %867 = vmatprep.mubr.msk.f32.mxu0 %vm301_vm0, %v282_v9  ;;  %v285_v12 = vld [vmem:[%s274_s19 + $0x18] sm:$0xff]  ;;  %v286_v13 = vld [vmem:[%s274_s19 + $0x20] sm:$0xff]  ;;  %v287_v14 = vld [vmem:[%s274_s19 + $0x28] sm:$0xff] }
  0x12   : > { %868 = vmatmul.mubr.msk.f32.vlgmr.msra.gmra.mrb[0].mxu0 %vm301_vm0, %v283_v10  ;;  %v288_v15 = vld [vmem:[%s274_s19 + $0x30] sm:$0xff]  ;;  %v289_v16 = vld [vmem:[%s274_s19 + $0x38] sm:$0xff] }
  0x13   : > { %870 = vmatprep.mubr.msk.f32.mxu0 %vm301_vm0, %v284_v11  ;;  %922 = vmatpush3.bf16.msra.mxu0 %v919_v8 }
  0x16   : > { %871 = vmatmul.mubr.msk.f32.gmra.mrb[2].mxu0 %vm301_vm0, %v285_v12 }
  0x17   : > { %873 = vmatprep.mubr.msk.f32.mxu0 %vm301_vm0, %v286_v13 }
  0x1a   : > { %874 = vmatmul.mubr.msk.f32.gmra.mrb[4].mxu0 %vm301_vm0, %v287_v14 }
  0x1b   : > { %876 = vmatprep.mubr.msk.f32.mxu0 %vm301_vm0, %v288_v15 }
  0x1e   : > { %877 = vmatmul.mubr.msk.f32.gmra.mrb[6].mxu0 %vm301_vm0, %v289_v16 }
  0xe5   : > { %v869_v21 = vpop.f32.mrb[0].mxu0 }
  0xe6   : > { %v398_v22 = vadd.f32 %v869_v21, %v798_v20  ;;  %v392_v23 = vpop.f32.mrb[1].mxu0 }
  0xe7   : > { %v393_v24 = vadd.f32 %v798_v20, %v392_v23 }
  0xe8   : > { %v432_v27 = vmax.f32 %v398_v22, 0.0 }
  0xe9   : > { %v431_v25 = vmax.f32 %v393_v24, 0.0  ;;  %v872_v26 = vpop.f32.mrb[2].mxu0 }
  0xea   : > { %v408_v28 = vadd.f32 %v872_v26, %v798_v20  ;;  %v402_v29 = vpop.f32.mrb[3].mxu0 }
  0xeb   : > { %v403_v30 = vadd.f32 %v798_v20, %v402_v29  ;;  %883 = vmatprep.mubr.msk.f32.mxu0 %vm448_vm1, %v431_v25 }
  0xec   : > { %884 = vmatmul.mubr.msk.f32.vlgmr.msra.gmra.mrb[8].mxu0 %vm448_vm1, %v432_v27  ;;  %v434_v33 = vmax.f32 %v408_v28, 0.0 }
  0xed   : > { %v433_v31 = vmax.f32 %v403_v30, 0.0  ;;  %v875_v32 = vpop.f32.mrb[4].mxu0 }
  0xee   : > { %v418_v34 = vadd.f32 %v875_v32, %v798_v20  ;;  %v412_v35 = vpop.f32.mrb[5].mxu0 }
  0xef   : > { %v413_v36 = vadd.f32 %v798_v20, %v412_v35  ;;  %886 = vmatprep.mubr.msk.f32.mxu1 %vm448_vm1, %v433_v31 }
  0xf0   : > { %887 = vmatmul.mubr.msk.f32.vlgmr.msra.gmra.mrb[0].mxu1 %vm448_vm1, %v434_v33  ;;  %v436_v39 = vmax.f32 %v418_v34, 0.0 }
  0xf1   : > { %v435_v37 = vmax.f32 %v413_v36, 0.0  ;;  %v878_v38 = vpop.f32.mrb[6].mxu0  ;;  %926 = vmatpush3.bf16.msra.mxu1 %v923_v19 }
  0xf2   : > { %v428_v40 = vadd.f32 %v878_v38, %v798_v20  ;;  %v422_v41 = vpop.f32.mrb[7].mxu0 }
  0xf3   : > { %v423_v42 = vadd.f32 %v798_v20, %v422_v41  ;;  %889 = vmatprep.mubr.msk.f32.mxu1 %vm448_vm1, %v435_v37 }
  0xf4   : > { %890 = vmatmul.mubr.msk.f32.gmra.mrb[2].mxu1 %vm448_vm1, %v436_v39  ;;  %v438_v44 = vmax.f32 %v428_v40, 0.0 }
  0xf5   : > { %v437_v43 = vmax.f32 %v423_v42, 0.0 }
  0xf7   : > { %892 = vmatprep.mubr.msk.f32.mxu1 %vm448_vm1, %v437_v43 }
  0xf8   : > { %893 = vmatmul.mubr.msk.f32.gmra.mrb[4].mxu1 %vm448_vm1, %v438_v44 }
 0x1bf   : > { %v885_v46 = vpop.f32.mrb[8].mxu0 }
 0x1c0   : > { %v545_v47 = vadd.f32 %v885_v46, %v807_v45  ;;  %v539_v48 = vpop.f32.mrb[9].mxu0 }
 0x1c1   : > { %v540_v49 = vadd.f32 %v807_v45, %v539_v48 }
 0x1c2   : > { %v579_v52 = vmax.f32 %v545_v47, 0.0 }
 0x1c3   : > { %v578_v50 = vmax.f32 %v540_v49, 0.0  ;;  %v888_v51 = vpop.f32.mrb[0].mxu1 }
 0x1c4   : > { %v555_v53 = vadd.f32 %v888_v51, %v807_v45  ;;  %v549_v54 = vpop.f32.mrb[1].mxu1 }
 0x1c5   : > { %v550_v55 = vadd.f32 %v807_v45, %v549_v54  ;;  %899 = vmatprep.mubr.msk.f32.mxu1 %vm448_vm1, %v578_v50 }
 0x1c6   : > { %900 = vmatmul.mubr.msk.f32.vlgmr.msra.gmra.mrb[6].mxu1 %vm448_vm1, %v579_v52  ;;  %v581_v58 = vmax.f32 %v555_v53, 0.0 }
 0x1c7   : > { %v580_v56 = vmax.f32 %v550_v55, 0.0  ;;  %v891_v57 = vpop.f32.mrb[2].mxu1 }
 0x1c8   : > { %v565_v59 = vadd.f32 %v891_v57, %v807_v45  ;;  %v559_v60 = vpop.f32.mrb[3].mxu1 }
 0x1c9   : > { %v560_v61 = vadd.f32 %v807_v45, %v559_v60  ;;  %902 = vmatprep.mubr.msk.f32.mxu1 %vm448_vm1, %v580_v56 }
 0x1ca   : > { %903 = vmatmul.mubr.msk.f32.gmra.mrb[8].mxu1 %vm448_vm1, %v581_v58  ;;  %v583_v0 = vmax.f32 %v565_v59, 0.0 }
 0x1cb   : > { %v582_v62 = vmax.f32 %v560_v61, 0.0  ;;  %v894_v63 = vpop.f32.mrb[4].mxu1 }
 0x1cc   : > { %v575_v1 = vadd.f32 %v894_v63, %v807_v45  ;;  %v569_v2 = vpop.f32.mrb[5].mxu1 }
 0x1cd   : > { %v570_v3 = vadd.f32 %v807_v45, %v569_v2  ;;  %905 = vmatprep.mubr.msk.f32.mxu1 %vm448_vm1, %v582_v62 }
 0x1ce   : > { %906 = vmatmul.mubr.msk.f32.gmra.mrb[10].mxu1 %vm448_vm1, %v583_v0  ;;  %v585_v5 = vmax.f32 %v575_v1, 0.0 }
 0x1cf   : > { %v584_v4 = vmax.f32 %v570_v3, 0.0 }
 0x1d1   : > { %908 = vmatprep.mubr.msk.f32.mxu1 %vm448_vm1, %v584_v4 }
 0x1d2   : > { %909 = vmatmul.mubr.msk.f32.gmra.mrb[12].mxu1 %vm448_vm1, %v585_v5 }
 0x299   : > { %v901_v7 = vpop.f32.mrb[6].mxu1 }
 0x29a   : > { %v691_v8 = vadd.f32 %v901_v7, %v816_v6  ;;  %v685_v9 = vpop.f32.mrb[7].mxu1 }
 0x29b   : > { %v686_v10 = vadd.f32 %v816_v6, %v685_v9 }
 0x29c   : > { %726 = vst.msk [vmem:[%s280_s11 + $0x8] sm:$0xff] %vm724_vm2, %v691_v8 }
 0x29d   : > { %725 = vst.msk [vmem:[%s280_s11] sm:$0xff] %vm724_vm2, %v686_v10  ;;  %v904_v11 = vpop.f32.mrb[8].mxu1 }
 0x29e   : > { %v701_v12 = vadd.f32 %v904_v11, %v816_v6  ;;  %v695_v13 = vpop.f32.mrb[9].mxu1 }
 0x29f   : > { %v696_v14 = vadd.f32 %v816_v6, %v695_v13 }
 0x2a0   : > { %728 = vst.msk [vmem:[%s280_s11 + $0x18] sm:$0xff] %vm724_vm2, %v701_v12 }
 0x2a1   : > { %727 = vst.msk [vmem:[%s280_s11 + $0x10] sm:$0xff] %vm724_vm2, %v696_v14  ;;  %v907_v15 = vpop.f32.mrb[10].mxu1 }
 0x2a2   : > { %v711_v16 = vadd.f32 %v907_v15, %v816_v6  ;;  %v705_v17 = vpop.f32.mrb[11].mxu1 }
 0x2a3   : > { %v706_v18 = vadd.f32 %v816_v6, %v705_v17 }
 0x2a4   : > { %730 = vst.msk [vmem:[%s280_s11 + $0x28] sm:$0xff] %vm724_vm2, %v711_v16 }
 0x2a5   : > { %729 = vst.msk [vmem:[%s280_s11 + $0x20] sm:$0xff] %vm724_vm2, %v706_v18  ;;  %v910_v19 = vpop.f32.mrb[12].mxu1 }
 0x2a6   : > { %v721_v20 = vadd.f32 %v910_v19, %v816_v6  ;;  %v715_v21 = vpop.f32.mrb[13].mxu1 }
 0x2a7   : > { %v716_v22 = vadd.f32 %v816_v6, %v715_v21 }
 0x2a8   : > { %732 = vst.msk [vmem:[%s280_s11 + $0x38] sm:$0xff] %vm724_vm2, %v721_v20 }
 0x2a9   : > { %731 = vst.msk [vmem:[%s280_s11 + $0x30] sm:$0xff] %vm724_vm2, %v716_v22 }
 0x2aa PF: > { %s17_s24 = sadd.s32 1, %s943_s24  }
 0x2ab   : > { %p14_p4 = scmp.ge.s32.totalorder %s17_s24, 6  }
 0x2ad   :  { %16 = sbr.rel (!%p14_p4) target bundleno = 1 (0x1), region = 78 }

</bundles_post_ra>
